<compile_context>
chip_gen: v7x
topology: tpu7x:2x2x1
jax: 0.10.0
libtpu: 0.0.40
codegen_flags: <defaults>
</compile_context>

<pallas_src>
import functools

import jax
import jax.numpy as jnp
from jax.experimental import pallas as pl
from jax.experimental.pallas import tpu as pltpu


# --------------------------------------------------------------------------
# TrajParamIndex (consistent with the module's usage)
# --------------------------------------------------------------------------
class TrajParamIndex:
    X = 0; Y = 1; Z = 2
    VX = 3; VY = 4; AX = 5; AY = 6
    COS_YAW = 7; SIN_YAW = 8
    LENGTH = 9; WIDTH = 10; HEIGHT = 11
    END_OF_INDEX = 22


REG_DIM = TrajParamIndex.HEIGHT + 1                  # 12
CLS_DIM = TrajParamIndex.END_OF_INDEX - REG_DIM      # 10
E = TrajParamIndex.END_OF_INDEX                      # 22
LN_EPS = 1e-5
NORM_EPS = 1e-12                                     # F.normalize eps
OUT_W = 32                                           # padded output lane width


# --------------------------------------------------------------------------
# In-kernel helpers
# --------------------------------------------------------------------------
def _layernorm(x, g, b):
    mu = jnp.mean(x, axis=-1, keepdims=True)
    var = jnp.mean((x - mu) ** 2, axis=-1, keepdims=True)
    return (x - mu) * jax.lax.rsqrt(var + LN_EPS) * g + b


def _dot(x, w):
    return jnp.dot(x, w, preferred_element_type=jnp.float32)


# --------------------------------------------------------------------------
# Pallas kernel
# --------------------------------------------------------------------------
def _refiner_kernel(cq_ref, pq_ref, tr_ref,
                    w_first_ref, b_first_ref, w_hidden_ref, vec_ref,
                    w_final_ref, b_final_ref, out_ref,
                    *, normalize_yaw: bool, with_quality: bool, hidden: int):
    H = hidden
    feat = cq_ref[...] + pq_ref[...]                          # (TM, Q)

    # Fused first layer of all branches: one (Q, n_branch*H) matmul.
    h0 = jnp.maximum(_dot(feat, w_first_ref[...]) + b_first_ref[...], 0.0)
    hr = h0[:, 0:H]
    hc = h0[:, H:2 * H]

    wh = w_hidden_ref[...]                                    # (n_hidden*H, H)
    vec = vec_ref[...]                                        # (n_vec_pad, H)
    W = lambda i: wh[H * i:H * (i + 1), :]                    # static sublane slice
    V = lambda i: vec[i:i + 1, :]                             # (1, H) row

    # reg branch: linear_relu_ln(H, in_loops=2, out_loops=2, Q) (L0 fused above)
    xr = jnp.maximum(_dot(hr, W(0)) + V(0), 0.0)
    xr = _layernorm(xr, V(1), V(2))
    xr = jnp.maximum(_dot(xr, W(1)) + V(3), 0.0)
    xr = jnp.maximum(_dot(xr, W(2)) + V(4), 0.0)
    xr = _layernorm(xr, V(5), V(6))

    # cls branch: linear_relu_ln(H, in_loops=1, out_loops=2, Q)
    xc = _layernorm(hc, V(7), V(8))
    xc = jnp.maximum(_dot(xc, W(3)) + V(9), 0.0)
    xc = _layernorm(xc, V(10), V(11))

    if with_quality:
        hq = h0[:, 2 * H:3 * H]
        xq = _layernorm(hq, V(12), V(13))
        xq = jnp.maximum(_dot(xq, W(4)) + V(14), 0.0)
        xq = _layernorm(xq, V(15), V(16))
        xcat = jnp.concatenate([xr, xc, xq], axis=-1)         # (TM, 3H)
    else:
        xcat = jnp.concatenate([xr, xc], axis=-1)             # (TM, 2H)

    # Fused block-diagonal head -> lanes [0:12]=reg, [12:22]=cls, [22:24]=quality
    final = _dot(xcat, w_final_ref[...]) + b_final_ref[...]   # (TM, OUT_W)

    if normalize_yaw:
        lane = jax.lax.broadcasted_iota(jnp.int32, final.shape, dimension=1)
        yaw_mask = ((lane == TrajParamIndex.COS_YAW) |
                    (lane == TrajParamIndex.SIN_YAW))
        s = jnp.sum(jnp.where(yaw_mask, final * final, 0.0),
                    axis=-1, keepdims=True)                   # cos^2 + sin^2
        # 1 / max(sqrt(s), eps) == rsqrt(max(s, eps^2))
        scale = jax.lax.rsqrt(jnp.maximum(s, NORM_EPS * NORM_EPS))
        final = jnp.where(yaw_mask, final * scale, final)

    # trajs slab already zero outside lanes [0:REG_DIM] -> single dense add/store
    out_ref[...] = final + tr_ref[...]


# --------------------------------------------------------------------------
# Parameter construction (deterministic, synthetic) — PyTorch-style layout
# --------------------------------------------------------------------------
def _xavier(key, fan_in, fan_out):
    std = (2.0 / (fan_in + fan_out)) ** 0.5
    return std * jax.random.normal(key, (fan_in, fan_out), dtype=jnp.float32)


def _make_branch_params(key, query_dim, hidden_dim, out_dim, in_loops, out_loops):
    """linear_relu_ln(hidden_dim, in_loops, out_loops, query_dim) + Linear(hidden_dim, out_dim)."""
    params = []
    in_dim = query_dim
    for _ in range(out_loops):
        for _ in range(in_loops):
            key, kw, kb = jax.random.split(key, 3)
            params.append(_xavier(kw, in_dim, hidden_dim))
            params.append(0.01 * jax.random.normal(kb, (1, hidden_dim), dtype=jnp.float32))
            in_dim = hidden_dim
        params.append(jnp.ones((1, hidden_dim), dtype=jnp.float32))   # LN gamma
        params.append(jnp.zeros((1, hidden_dim), dtype=jnp.float32))  # LN beta
    key, kw, kb = jax.random.split(key, 3)
    params.append(_xavier(kw, hidden_dim, out_dim))
    params.append(0.01 * jax.random.normal(kb, (1, out_dim), dtype=jnp.float32))
    return params


# --------------------------------------------------------------------------
# Parameter packing into a handful of slabs (wrapper-side, one time)
# --------------------------------------------------------------------------
def _pack_params(params, with_quality):
    reg_p, cls_p, qual_p = params
    (rw0, rb0, rw1, rb1, rg0, rt0, rw2, rb2, rw3, rb3, rg1, rt1, rwo, rbo) = reg_p
    (cw0, cb0, cg0, ct0, cw1, cb1, cg1, ct1, cwo, cbo) = cls_p
    H = rw0.shape[1]

    first_w = [rw0, cw0]
    first_b = [rb0, cb0]
    hidden_ws = [rw1, rw2, rw3, cw1]
    vec_rows = [rb1, rg0, rt0, rb2, rb3, rg1, rt1, cg0, ct0, cb1, cg1, ct1]
    if with_quality:
        (qw0, qb0, qg0, qt0, qw1, qb1, qg1, qt1, qwo, qbo) = qual_p
        first_w.append(qw0); first_b.append(qb0)
        hidden_ws.append(qw1)
        vec_rows += [qg0, qt0, qb1, qg1, qt1]

    w_first = jnp.concatenate(first_w, axis=1)                      # (Q, nb*H)
    b_first = jnp.concatenate(first_b, axis=1)                      # (1, nb*H)
    w_hidden = jnp.concatenate(hidden_ws, axis=0)                   # (n*H, H)

    n_vec = len(vec_rows)
    n_vec_pad = ((n_vec + 7) // 8) * 8
    if n_vec_pad > n_vec:
        vec_rows = vec_rows + [jnp.zeros((n_vec_pad - n_vec, H), jnp.float32)]
    vec = jnp.concatenate(vec_rows, axis=0)                         # (n_vec_pad, H)

    nb = 3 if with_quality else 2
    w_final = jnp.zeros((nb * H, OUT_W), jnp.float32)
    w_final = w_final.at[0:H, 0:REG_DIM].set(rwo)
    w_final = w_final.at[H:2 * H, REG_DIM:E].set(cwo)
    b_final = jnp.zeros((1, OUT_W), jnp.float32)
    b_final = b_final.at[:, 0:REG_DIM].set(rbo)
    b_final = b_final.at[:, REG_DIM:E].set(cbo)
    if with_quality:
        w_final = w_final.at[2 * H:3 * H, E:E + 2].set(qwo)
        b_final = b_final.at[:, E:E + 2].set(qbo)

    return w_first, b_first, w_hidden, vec, w_final, b_final


# --------------------------------------------------------------------------
# Pure-JAX reference (for correctness check)
# --------------------------------------------------------------------------
def _ref_mlp_2x2(x, p):
    (w0, b0, w1, b1, g0, t0, w2, b2, w3, b3, g1, t1, wo, bo) = p
    x = jax.nn.relu(x @ w0 + b0)
    x = jax.nn.relu(x @ w1 + b1)
    x = (x - x.mean(-1, keepdims=True)) / jnp.sqrt(x.var(-1, keepdims=True) + LN_EPS) * g0 + t0
    x = jax.nn.relu(x @ w2 + b2)
    x = jax.nn.relu(x @ w3 + b3)
    x = (x - x.mean(-1, keepdims=True)) / jnp.sqrt(x.var(-1, keepdims=True) + LN_EPS) * g1 + t1
    return x @ wo + bo


def _ref_mlp_1x2(x, p):
    (w0, b0, g0, t0, w1, b1, g1, t1, wo, bo) = p
    x = jax.nn.relu(x @ w0 + b0)
    x = (x - x.mean(-1, keepdims=True)) / jnp.sqrt(x.var(-1, keepdims=True) + LN_EPS) * g0 + t0
    x = jax.nn.relu(x @ w1 + b1)
    x = (x - x.mean(-1, keepdims=True)) / jnp.sqrt(x.var(-1, keepdims=True) + LN_EPS) * g1 + t1
    return x @ wo + bo


def trajectory_refiner_reference(content_query, pos_query, trajs, params,
                                 normalize_yaw, with_quality):
    reg_p, cls_p, qual_p = params
    feat = content_query + pos_query
    reg = _ref_mlp_2x2(feat, reg_p)
    cls = _ref_mlp_1x2(feat, cls_p)
    if normalize_yaw:
        yaw = reg[..., [TrajParamIndex.COS_YAW, TrajParamIndex.SIN_YAW]]
        yaw = yaw / jnp.maximum(jnp.linalg.norm(yaw, axis=-1, keepdims=True), NORM_EPS)
        reg = reg.at[..., TrajParamIndex.COS_YAW].set(yaw[..., 0])
        reg = reg.at[..., TrajParamIndex.SIN_YAW].set(yaw[..., 1])
    refined = jnp.concatenate([reg + trajs[..., :REG_DIM], cls], axis=-1)
    quality = _ref_mlp_1x2(feat, qual_p) if with_quality else None
    return refined, quality


# --------------------------------------------------------------------------
# Wrapper calling pallas_call
# --------------------------------------------------------------------------
def trajectory_refiner(content_query, pos_query, trajs, params,
                       normalize_yaw=True, with_quality=True):
    B, N, Q = content_query.shape
    assert trajs.shape[-1] == E
    M = B * N
    hidden = params[0][0].shape[1]

    w_first, b_first, w_hidden, vec, w_final, b_final = _pack_params(params, with_quality)

    # Row tiling (M axis "parallel" -> megacore-sharded on v7x).
    TM = 256
    if M <= TM:
        TM = max(8, ((M + 7) // 8) * 8)
    M_pad = ((M + TM - 1) // TM) * TM

    def pad_rows(x, width):
        out = jnp.zeros((M_pad, width), jnp.float32)
        return out.at[:M, :x.shape[1]].set(x)

    cq = pad_rows(content_query.reshape(M, Q), Q)
    pq = pad_rows(pos_query.reshape(M, Q), Q)
    # trajs slab: lanes [0:REG_DIM] hold trajs[..., :REG_DIM], rest zero.
    tr = pad_rows(trajs.reshape(M, E)[:, :REG_DIM], OUT_W)

    kernel = functools.partial(_refiner_kernel,
                               normalize_yaw=normalize_yaw,
                               with_quality=with_quality,
                               hidden=hidden)

    def row_spec(width):
        return pl.BlockSpec((TM, width), lambda i: (i, 0))

    def full_spec(a):
        return pl.BlockSpec(a.shape, lambda i: (0,) * a.ndim)

    out = pl.pallas_call(
        kernel,
        out_shape=jax.ShapeDtypeStruct((M_pad, OUT_W), jnp.float32),
        grid=(M_pad // TM,),
        in_specs=[row_spec(Q), row_spec(Q), row_spec(OUT_W),
                  full_spec(w_first), full_spec(b_first),
                  full_spec(w_hidden), full_spec(vec),
                  full_spec(w_final), full_spec(b_final)],
        out_specs=row_spec(OUT_W),
        compiler_params=pltpu.CompilerParams(
            dimension_semantics=("parallel",)),
    )(cq, pq, tr, w_first, b_first, w_hidden, vec, w_final, b_final)

    refined = out[:M, :E].reshape(B, N, E)
    quality = out[:M, E:E + 2].reshape(B, N, 2) if with_quality else None
    return refined, quality


# --------------------------------------------------------------------------
# Main
# --------------------------------------------------------------------------
if __name__ == "__main__":
    B, N = 2, 8
    query_dim = 32
    hidden_dim = 32
    normalize_yaw = True
    with_quality = True

    key = jax.random.PRNGKey(0)
    k_cq, k_pq, k_tr, k_reg, k_cls, k_qual = jax.random.split(key, 6)

    content_query = jax.random.normal(k_cq, (B, N, query_dim), dtype=jnp.float32)
    pos_query = jax.random.normal(k_pq, (B, N, query_dim), dtype=jnp.float32)
    trajs = jax.random.normal(k_tr, (B, N, TrajParamIndex.END_OF_INDEX), dtype=jnp.float32)

    reg_params = _make_branch_params(k_reg, query_dim, hidden_dim, REG_DIM,
                                     in_loops=2, out_loops=2)
    cls_params = _make_branch_params(k_cls, query_dim, hidden_dim, CLS_DIM,
                                     in_loops=1, out_loops=2)
    qual_params = _make_branch_params(k_qual, query_dim, hidden_dim, 2,
                                      in_loops=1, out_loops=2)
    params = (reg_params, cls_params, qual_params)

    refined, quality = trajectory_refiner(content_query, pos_query, trajs, params,
                                          normalize_yaw=normalize_yaw,
                                          with_quality=with_quality)
    refined = jax.block_until_ready(refined)
    quality = jax.block_until_ready(quality)

    ref_refined, ref_quality = trajectory_refiner_reference(
        content_query, pos_query, trajs, params, normalize_yaw, with_quality)

    assert refined.shape == (B, N, TrajParamIndex.END_OF_INDEX)
    assert quality.shape == (B, N, 2)
    assert jnp.allclose(refined, ref_refined, atol=1e-4, rtol=1e-4)
    assert jnp.allclose(quality, ref_quality, atol=1e-4, rtol=1e-4)

    print("KERNEL_OK")
</pallas_src>

<mosaic_0001>
module attributes {stable_mosaic.version = 11 : i64} {
  func.func @_refiner_kernel(%arg0: i32, %arg1: memref<16x32xf32, #tpu.memory_space<vmem>>, %arg2: memref<16x32xf32, #tpu.memory_space<vmem>>, %arg3: memref<16x32xf32, #tpu.memory_space<vmem>>, %arg4: memref<32x96xf32, #tpu.memory_space<vmem>>, %arg5: memref<1x96xf32, #tpu.memory_space<vmem>>, %arg6: memref<160x32xf32, #tpu.memory_space<vmem>>, %arg7: memref<24x32xf32, #tpu.memory_space<vmem>>, %arg8: memref<96x32xf32, #tpu.memory_space<vmem>>, %arg9: memref<1x32xf32, #tpu.memory_space<vmem>>, %arg10: memref<16x32xf32, #tpu.memory_space<vmem>>) attributes {dimension_semantics = [#tpu.dimension_semantics<parallel>], iteration_bounds = array<i64: 1>, scalar_prefetch = 0 : i64, scratch_operands = 0 : i64, tpu.core_type = #tpu.core_type<tc>, window_params = [{transform_indices = @transform_0, window_bounds = array<i64: 16, 32>}, {transform_indices = @transform_1, window_bounds = array<i64: 16, 32>}, {transform_indices = @transform_2, window_bounds = array<i64: 16, 32>}, {pipeline_mode = #tpu.pipeline_mode<synchronous>, transform_indices = @transform_3, window_bounds = array<i64: 32, 96>}, {pipeline_mode = #tpu.pipeline_mode<synchronous>, transform_indices = @transform_4, window_bounds = array<i64: 1, 96>}, {pipeline_mode = #tpu.pipeline_mode<synchronous>, transform_indices = @transform_5, window_bounds = array<i64: 160, 32>}, {pipeline_mode = #tpu.pipeline_mode<synchronous>, transform_indices = @transform_6, window_bounds = array<i64: 24, 32>}, {pipeline_mode = #tpu.pipeline_mode<synchronous>, transform_indices = @transform_7, window_bounds = array<i64: 96, 32>}, {pipeline_mode = #tpu.pipeline_mode<synchronous>, transform_indices = @transform_8, window_bounds = array<i64: 1, 32>}, {transform_indices = @transform_9, window_bounds = array<i64: 16, 32>}]} {
    %c0 = arith.constant 0 : index
    %c0_0 = arith.constant 0 : index
    %0 = vector.load %arg1[%c0, %c0_0] : memref<16x32xf32, #tpu.memory_space<vmem>>, vector<16x32xf32>
    %c0_1 = arith.constant 0 : index
    %c0_2 = arith.constant 0 : index
    %1 = vector.load %arg2[%c0_1, %c0_2] : memref<16x32xf32, #tpu.memory_space<vmem>>, vector<16x32xf32>
    %2 = arith.addf %0, %1 : vector<16x32xf32>
    %c0_3 = arith.constant 0 : index
    %c0_4 = arith.constant 0 : index
    %3 = vector.load %arg4[%c0_3, %c0_4] : memref<32x96xf32, #tpu.memory_space<vmem>>, vector<32x96xf32>
    %cst = arith.constant dense<0.000000e+00> : vector<16x96xf32>
    %4 = tpu.matmul %2, %3, %cst {dimension_numbers = #tpu.dot_dimension_numbers<[1], [0], [0], [1], [0, 0, 1, 1], [], []>} : vector<16x32xf32>, vector<32x96xf32>, vector<16x96xf32> -> vector<16x96xf32>
    %c0_5 = arith.constant 0 : index
    %c0_6 = arith.constant 0 : index
    %5 = vector.load %arg5[%c0_5, %c0_6] : memref<1x96xf32, #tpu.memory_space<vmem>>, vector<1x96xf32>
    %6 = vector.broadcast %5 : vector<1x96xf32> to vector<16x96xf32>
    %7 = arith.addf %4, %6 : vector<16x96xf32>
    %cst_7 = arith.constant 0.000000e+00 : f32
    %8 = vector.broadcast %cst_7 : f32 to vector<16x96xf32>
    %9 = arith.maximumf %7, %8 : vector<16x96xf32>
    %10 = vector.extract_strided_slice %9 {offsets = [0, 0], sizes = [16, 32], strides = [1, 1]} : vector<16x96xf32> to vector<16x32xf32>
    %11 = vector.extract_strided_slice %9 {offsets = [0, 32], sizes = [16, 32], strides = [1, 1]} : vector<16x96xf32> to vector<16x32xf32>
    %c0_8 = arith.constant 0 : index
    %c0_9 = arith.constant 0 : index
    %12 = vector.load %arg6[%c0_8, %c0_9] : memref<160x32xf32, #tpu.memory_space<vmem>>, vector<160x32xf32>
    %c0_10 = arith.constant 0 : index
    %c0_11 = arith.constant 0 : index
    %13 = vector.load %arg7[%c0_10, %c0_11] : memref<24x32xf32, #tpu.memory_space<vmem>>, vector<24x32xf32>
    %14 = vector.extract_strided_slice %12 {offsets = [0, 0], sizes = [32, 32], strides = [1, 1]} : vector<160x32xf32> to vector<32x32xf32>
    %cst_12 = arith.constant dense<0.000000e+00> : vector<16x32xf32>
    %15 = tpu.matmul %10, %14, %cst_12 {dimension_numbers = #tpu.dot_dimension_numbers<[1], [0], [0], [1], [0, 0, 1, 1], [], []>} : vector<16x32xf32>, vector<32x32xf32>, vector<16x32xf32> -> vector<16x32xf32>
    %16 = vector.extract_strided_slice %13 {offsets = [0, 0], sizes = [1, 32], strides = [1, 1]} : vector<24x32xf32> to vector<1x32xf32>
    %17 = vector.broadcast %16 : vector<1x32xf32> to vector<16x32xf32>
    %18 = arith.addf %15, %17 : vector<16x32xf32>
    %cst_13 = arith.constant 0.000000e+00 : f32
    %19 = vector.broadcast %cst_13 : f32 to vector<16x32xf32>
    %20 = arith.maximumf %18, %19 : vector<16x32xf32>
    %21 = vector.extract_strided_slice %13 {offsets = [1, 0], sizes = [1, 32], strides = [1, 1]} : vector<24x32xf32> to vector<1x32xf32>
    %22 = vector.extract_strided_slice %13 {offsets = [2, 0], sizes = [1, 32], strides = [1, 1]} : vector<24x32xf32> to vector<1x32xf32>
    %cst_14 = arith.constant dense<0.000000e+00> : vector<16xf32>
    %23 = vector.multi_reduction <add>, %20, %cst_14 [1] : vector<16x32xf32> to vector<16xf32>
    %24 = vector.shape_cast %23 : vector<16xf32> to vector<16x1xf32>
    %cst_15 = arith.constant 3.200000e+01 : f32
    %25 = vector.broadcast %cst_15 : f32 to vector<16x1xf32>
    %26 = arith.divf %24, %25 : vector<16x1xf32>
    %27 = vector.broadcast %26 : vector<16x1xf32> to vector<16x32xf32>
    %28 = arith.subf %20, %27 : vector<16x32xf32>
    %29 = arith.mulf %28, %28 : vector<16x32xf32>
    %cst_16 = arith.constant dense<0.000000e+00> : vector<16xf32>
    %30 = vector.multi_reduction <add>, %29, %cst_16 [1] : vector<16x32xf32> to vector<16xf32>
    %31 = vector.shape_cast %30 : vector<16xf32> to vector<16x1xf32>
    %cst_17 = arith.constant 3.200000e+01 : f32
    %32 = vector.broadcast %cst_17 : f32 to vector<16x1xf32>
    %33 = arith.divf %31, %32 : vector<16x1xf32>
    %34 = vector.broadcast %26 : vector<16x1xf32> to vector<16x32xf32>
    %35 = arith.subf %20, %34 : vector<16x32xf32>
    %cst_18 = arith.constant 9.99999974E-6 : f32
    %36 = vector.broadcast %cst_18 : f32 to vector<16x1xf32>
    %37 = arith.addf %33, %36 : vector<16x1xf32>
    %38 = math.rsqrt %37 : vector<16x1xf32>
    %39 = vector.broadcast %38 : vector<16x1xf32> to vector<16x32xf32>
    %40 = arith.mulf %35, %39 : vector<16x32xf32>
    %41 = vector.broadcast %21 : vector<1x32xf32> to vector<16x32xf32>
    %42 = arith.mulf %40, %41 : vector<16x32xf32>
    %43 = vector.broadcast %22 : vector<1x32xf32> to vector<16x32xf32>
    %44 = arith.addf %42, %43 : vector<16x32xf32>
    %45 = vector.extract_strided_slice %12 {offsets = [32, 0], sizes = [32, 32], strides = [1, 1]} : vector<160x32xf32> to vector<32x32xf32>
    %cst_19 = arith.constant dense<0.000000e+00> : vector<16x32xf32>
    %46 = tpu.matmul %44, %45, %cst_19 {dimension_numbers = #tpu.dot_dimension_numbers<[1], [0], [0], [1], [0, 0, 1, 1], [], []>} : vector<16x32xf32>, vector<32x32xf32>, vector<16x32xf32> -> vector<16x32xf32>
    %47 = vector.extract_strided_slice %13 {offsets = [3, 0], sizes = [1, 32], strides = [1, 1]} : vector<24x32xf32> to vector<1x32xf32>
    %48 = vector.broadcast %47 : vector<1x32xf32> to vector<16x32xf32>
    %49 = arith.addf %46, %48 : vector<16x32xf32>
    %cst_20 = arith.constant 0.000000e+00 : f32
    %50 = vector.broadcast %cst_20 : f32 to vector<16x32xf32>
    %51 = arith.maximumf %49, %50 : vector<16x32xf32>
    %52 = vector.extract_strided_slice %12 {offsets = [64, 0], sizes = [32, 32], strides = [1, 1]} : vector<160x32xf32> to vector<32x32xf32>
    %cst_21 = arith.constant dense<0.000000e+00> : vector<16x32xf32>
    %53 = tpu.matmul %51, %52, %cst_21 {dimension_numbers = #tpu.dot_dimension_numbers<[1], [0], [0], [1], [0, 0, 1, 1], [], []>} : vector<16x32xf32>, vector<32x32xf32>, vector<16x32xf32> -> vector<16x32xf32>
    %54 = vector.extract_strided_slice %13 {offsets = [4, 0], sizes = [1, 32], strides = [1, 1]} : vector<24x32xf32> to vector<1x32xf32>
    %55 = vector.broadcast %54 : vector<1x32xf32> to vector<16x32xf32>
    %56 = arith.addf %53, %55 : vector<16x32xf32>
    %cst_22 = arith.constant 0.000000e+00 : f32
    %57 = vector.broadcast %cst_22 : f32 to vector<16x32xf32>
    %58 = arith.maximumf %56, %57 : vector<16x32xf32>
    %59 = vector.extract_strided_slice %13 {offsets = [5, 0], sizes = [1, 32], strides = [1, 1]} : vector<24x32xf32> to vector<1x32xf32>
    %60 = vector.extract_strided_slice %13 {offsets = [6, 0], sizes = [1, 32], strides = [1, 1]} : vector<24x32xf32> to vector<1x32xf32>
    %cst_23 = arith.constant dense<0.000000e+00> : vector<16xf32>
    %61 = vector.multi_reduction <add>, %58, %cst_23 [1] : vector<16x32xf32> to vector<16xf32>
    %62 = vector.shape_cast %61 : vector<16xf32> to vector<16x1xf32>
    %cst_24 = arith.constant 3.200000e+01 : f32
    %63 = vector.broadcast %cst_24 : f32 to vector<16x1xf32>
    %64 = arith.divf %62, %63 : vector<16x1xf32>
    %65 = vector.broadcast %64 : vector<16x1xf32> to vector<16x32xf32>
    %66 = arith.subf %58, %65 : vector<16x32xf32>
    %67 = arith.mulf %66, %66 : vector<16x32xf32>
    %cst_25 = arith.constant dense<0.000000e+00> : vector<16xf32>
    %68 = vector.multi_reduction <add>, %67, %cst_25 [1] : vector<16x32xf32> to vector<16xf32>
    %69 = vector.shape_cast %68 : vector<16xf32> to vector<16x1xf32>
    %cst_26 = arith.constant 3.200000e+01 : f32
    %70 = vector.broadcast %cst_26 : f32 to vector<16x1xf32>
    %71 = arith.divf %69, %70 : vector<16x1xf32>
    %72 = vector.broadcast %64 : vector<16x1xf32> to vector<16x32xf32>
    %73 = arith.subf %58, %72 : vector<16x32xf32>
    %cst_27 = arith.constant 9.99999974E-6 : f32
    %74 = vector.broadcast %cst_27 : f32 to vector<16x1xf32>
    %75 = arith.addf %71, %74 : vector<16x1xf32>
    %76 = math.rsqrt %75 : vector<16x1xf32>
    %77 = vector.broadcast %76 : vector<16x1xf32> to vector<16x32xf32>
    %78 = arith.mulf %73, %77 : vector<16x32xf32>
    %79 = vector.broadcast %59 : vector<1x32xf32> to vector<16x32xf32>
    %80 = arith.mulf %78, %79 : vector<16x32xf32>
    %81 = vector.broadcast %60 : vector<1x32xf32> to vector<16x32xf32>
    %82 = arith.addf %80, %81 : vector<16x32xf32>
    %83 = vector.extract_strided_slice %13 {offsets = [7, 0], sizes = [1, 32], strides = [1, 1]} : vector<24x32xf32> to vector<1x32xf32>
    %84 = vector.extract_strided_slice %13 {offsets = [8, 0], sizes = [1, 32], strides = [1, 1]} : vector<24x32xf32> to vector<1x32xf32>
    %cst_28 = arith.constant dense<0.000000e+00> : vector<16xf32>
    %85 = vector.multi_reduction <add>, %11, %cst_28 [1] : vector<16x32xf32> to vector<16xf32>
    %86 = vector.shape_cast %85 : vector<16xf32> to vector<16x1xf32>
    %cst_29 = arith.constant 3.200000e+01 : f32
    %87 = vector.broadcast %cst_29 : f32 to vector<16x1xf32>
    %88 = arith.divf %86, %87 : vector<16x1xf32>
    %89 = vector.broadcast %88 : vector<16x1xf32> to vector<16x32xf32>
    %90 = arith.subf %11, %89 : vector<16x32xf32>
    %91 = arith.mulf %90, %90 : vector<16x32xf32>
    %cst_30 = arith.constant dense<0.000000e+00> : vector<16xf32>
    %92 = vector.multi_reduction <add>, %91, %cst_30 [1] : vector<16x32xf32> to vector<16xf32>
    %93 = vector.shape_cast %92 : vector<16xf32> to vector<16x1xf32>
    %cst_31 = arith.constant 3.200000e+01 : f32
    %94 = vector.broadcast %cst_31 : f32 to vector<16x1xf32>
    %95 = arith.divf %93, %94 : vector<16x1xf32>
    %96 = vector.broadcast %88 : vector<16x1xf32> to vector<16x32xf32>
    %97 = arith.subf %11, %96 : vector<16x32xf32>
    %cst_32 = arith.constant 9.99999974E-6 : f32
    %98 = vector.broadcast %cst_32 : f32 to vector<16x1xf32>
    %99 = arith.addf %95, %98 : vector<16x1xf32>
    %100 = math.rsqrt %99 : vector<16x1xf32>
    %101 = vector.broadcast %100 : vector<16x1xf32> to vector<16x32xf32>
    %102 = arith.mulf %97, %101 : vector<16x32xf32>
    %103 = vector.broadcast %83 : vector<1x32xf32> to vector<16x32xf32>
    %104 = arith.mulf %102, %103 : vector<16x32xf32>
    %105 = vector.broadcast %84 : vector<1x32xf32> to vector<16x32xf32>
    %106 = arith.addf %104, %105 : vector<16x32xf32>
    %107 = vector.extract_strided_slice %12 {offsets = [96, 0], sizes = [32, 32], strides = [1, 1]} : vector<160x32xf32> to vector<32x32xf32>
    %cst_33 = arith.constant dense<0.000000e+00> : vector<16x32xf32>
    %108 = tpu.matmul %106, %107, %cst_33 {dimension_numbers = #tpu.dot_dimension_numbers<[1], [0], [0], [1], [0, 0, 1, 1], [], []>} : vector<16x32xf32>, vector<32x32xf32>, vector<16x32xf32> -> vector<16x32xf32>
    %109 = vector.extract_strided_slice %13 {offsets = [9, 0], sizes = [1, 32], strides = [1, 1]} : vector<24x32xf32> to vector<1x32xf32>
    %110 = vector.broadcast %109 : vector<1x32xf32> to vector<16x32xf32>
    %111 = arith.addf %108, %110 : vector<16x32xf32>
    %cst_34 = arith.constant 0.000000e+00 : f32
    %112 = vector.broadcast %cst_34 : f32 to vector<16x32xf32>
    %113 = arith.maximumf %111, %112 : vector<16x32xf32>
    %114 = vector.extract_strided_slice %13 {offsets = [10, 0], sizes = [1, 32], strides = [1, 1]} : vector<24x32xf32> to vector<1x32xf32>
    %115 = vector.extract_strided_slice %13 {offsets = [11, 0], sizes = [1, 32], strides = [1, 1]} : vector<24x32xf32> to vector<1x32xf32>
    %cst_35 = arith.constant dense<0.000000e+00> : vector<16xf32>
    %116 = vector.multi_reduction <add>, %113, %cst_35 [1] : vector<16x32xf32> to vector<16xf32>
    %117 = vector.shape_cast %116 : vector<16xf32> to vector<16x1xf32>
    %cst_36 = arith.constant 3.200000e+01 : f32
    %118 = vector.broadcast %cst_36 : f32 to vector<16x1xf32>
    %119 = arith.divf %117, %118 : vector<16x1xf32>
    %120 = vector.broadcast %119 : vector<16x1xf32> to vector<16x32xf32>
    %121 = arith.subf %113, %120 : vector<16x32xf32>
    %122 = arith.mulf %121, %121 : vector<16x32xf32>
    %cst_37 = arith.constant dense<0.000000e+00> : vector<16xf32>
    %123 = vector.multi_reduction <add>, %122, %cst_37 [1] : vector<16x32xf32> to vector<16xf32>
    %124 = vector.shape_cast %123 : vector<16xf32> to vector<16x1xf32>
    %cst_38 = arith.constant 3.200000e+01 : f32
    %125 = vector.broadcast %cst_38 : f32 to vector<16x1xf32>
    %126 = arith.divf %124, %125 : vector<16x1xf32>
    %127 = vector.broadcast %119 : vector<16x1xf32> to vector<16x32xf32>
    %128 = arith.subf %113, %127 : vector<16x32xf32>
    %cst_39 = arith.constant 9.99999974E-6 : f32
    %129 = vector.broadcast %cst_39 : f32 to vector<16x1xf32>
    %130 = arith.addf %126, %129 : vector<16x1xf32>
    %131 = math.rsqrt %130 : vector<16x1xf32>
    %132 = vector.broadcast %131 : vector<16x1xf32> to vector<16x32xf32>
    %133 = arith.mulf %128, %132 : vector<16x32xf32>
    %134 = vector.broadcast %114 : vector<1x32xf32> to vector<16x32xf32>
    %135 = arith.mulf %133, %134 : vector<16x32xf32>
    %136 = vector.broadcast %115 : vector<1x32xf32> to vector<16x32xf32>
    %137 = arith.addf %135, %136 : vector<16x32xf32>
    %138 = vector.extract_strided_slice %9 {offsets = [0, 64], sizes = [16, 32], strides = [1, 1]} : vector<16x96xf32> to vector<16x32xf32>
    %139 = vector.extract_strided_slice %13 {offsets = [12, 0], sizes = [1, 32], strides = [1, 1]} : vector<24x32xf32> to vector<1x32xf32>
    %140 = vector.extract_strided_slice %13 {offsets = [13, 0], sizes = [1, 32], strides = [1, 1]} : vector<24x32xf32> to vector<1x32xf32>
    %cst_40 = arith.constant dense<0.000000e+00> : vector<16xf32>
    %141 = vector.multi_reduction <add>, %138, %cst_40 [1] : vector<16x32xf32> to vector<16xf32>
    %142 = vector.shape_cast %141 : vector<16xf32> to vector<16x1xf32>
    %cst_41 = arith.constant 3.200000e+01 : f32
    %143 = vector.broadcast %cst_41 : f32 to vector<16x1xf32>
    %144 = arith.divf %142, %143 : vector<16x1xf32>
    %145 = vector.broadcast %144 : vector<16x1xf32> to vector<16x32xf32>
    %146 = arith.subf %138, %145 : vector<16x32xf32>
    %147 = arith.mulf %146, %146 : vector<16x32xf32>
    %cst_42 = arith.constant dense<0.000000e+00> : vector<16xf32>
    %148 = vector.multi_reduction <add>, %147, %cst_42 [1] : vector<16x32xf32> to vector<16xf32>
    %149 = vector.shape_cast %148 : vector<16xf32> to vector<16x1xf32>
    %cst_43 = arith.constant 3.200000e+01 : f32
    %150 = vector.broadcast %cst_43 : f32 to vector<16x1xf32>
    %151 = arith.divf %149, %150 : vector<16x1xf32>
    %152 = vector.broadcast %144 : vector<16x1xf32> to vector<16x32xf32>
    %153 = arith.subf %138, %152 : vector<16x32xf32>
    %cst_44 = arith.constant 9.99999974E-6 : f32
    %154 = vector.broadcast %cst_44 : f32 to vector<16x1xf32>
    %155 = arith.addf %151, %154 : vector<16x1xf32>
    %156 = math.rsqrt %155 : vector<16x1xf32>
    %157 = vector.broadcast %156 : vector<16x1xf32> to vector<16x32xf32>
    %158 = arith.mulf %153, %157 : vector<16x32xf32>
    %159 = vector.broadcast %139 : vector<1x32xf32> to vector<16x32xf32>
    %160 = arith.mulf %158, %159 : vector<16x32xf32>
    %161 = vector.broadcast %140 : vector<1x32xf32> to vector<16x32xf32>
    %162 = arith.addf %160, %161 : vector<16x32xf32>
    %163 = vector.extract_strided_slice %12 {offsets = [128, 0], sizes = [32, 32], strides = [1, 1]} : vector<160x32xf32> to vector<32x32xf32>
    %cst_45 = arith.constant dense<0.000000e+00> : vector<16x32xf32>
    %164 = tpu.matmul %162, %163, %cst_45 {dimension_numbers = #tpu.dot_dimension_numbers<[1], [0], [0], [1], [0, 0, 1, 1], [], []>} : vector<16x32xf32>, vector<32x32xf32>, vector<16x32xf32> -> vector<16x32xf32>
    %165 = vector.extract_strided_slice %13 {offsets = [14, 0], sizes = [1, 32], strides = [1, 1]} : vector<24x32xf32> to vector<1x32xf32>
    %166 = vector.broadcast %165 : vector<1x32xf32> to vector<16x32xf32>
    %167 = arith.addf %164, %166 : vector<16x32xf32>
    %cst_46 = arith.constant 0.000000e+00 : f32
    %168 = vector.broadcast %cst_46 : f32 to vector<16x32xf32>
    %169 = arith.maximumf %167, %168 : vector<16x32xf32>
    %170 = vector.extract_strided_slice %13 {offsets = [15, 0], sizes = [1, 32], strides = [1, 1]} : vector<24x32xf32> to vector<1x32xf32>
    %171 = vector.extract_strided_slice %13 {offsets = [16, 0], sizes = [1, 32], strides = [1, 1]} : vector<24x32xf32> to vector<1x32xf32>
    %cst_47 = arith.constant dense<0.000000e+00> : vector<16xf32>
    %172 = vector.multi_reduction <add>, %169, %cst_47 [1] : vector<16x32xf32> to vector<16xf32>
    %173 = vector.shape_cast %172 : vector<16xf32> to vector<16x1xf32>
    %cst_48 = arith.constant 3.200000e+01 : f32
    %174 = vector.broadcast %cst_48 : f32 to vector<16x1xf32>
    %175 = arith.divf %173, %174 : vector<16x1xf32>
    %176 = vector.broadcast %175 : vector<16x1xf32> to vector<16x32xf32>
    %177 = arith.subf %169, %176 : vector<16x32xf32>
    %178 = arith.mulf %177, %177 : vector<16x32xf32>
    %cst_49 = arith.constant dense<0.000000e+00> : vector<16xf32>
    %179 = vector.multi_reduction <add>, %178, %cst_49 [1] : vector<16x32xf32> to vector<16xf32>
    %180 = vector.shape_cast %179 : vector<16xf32> to vector<16x1xf32>
    %cst_50 = arith.constant 3.200000e+01 : f32
    %181 = vector.broadcast %cst_50 : f32 to vector<16x1xf32>
    %182 = arith.divf %180, %181 : vector<16x1xf32>
    %183 = vector.broadcast %175 : vector<16x1xf32> to vector<16x32xf32>
    %184 = arith.subf %169, %183 : vector<16x32xf32>
    %cst_51 = arith.constant 9.99999974E-6 : f32
    %185 = vector.broadcast %cst_51 : f32 to vector<16x1xf32>
    %186 = arith.addf %182, %185 : vector<16x1xf32>
    %187 = math.rsqrt %186 : vector<16x1xf32>
    %188 = vector.broadcast %187 : vector<16x1xf32> to vector<16x32xf32>
    %189 = arith.mulf %184, %188 : vector<16x32xf32>
    %190 = vector.broadcast %170 : vector<1x32xf32> to vector<16x32xf32>
    %191 = arith.mulf %189, %190 : vector<16x32xf32>
    %192 = vector.broadcast %171 : vector<1x32xf32> to vector<16x32xf32>
    %193 = arith.addf %191, %192 : vector<16x32xf32>
    %194 = tpu.concatenate %82, %137, %193 in 1 : vector<16x32xf32>, vector<16x32xf32>, vector<16x32xf32> -> vector<16x96xf32>
    %c0_52 = arith.constant 0 : index
    %c0_53 = arith.constant 0 : index
    %195 = vector.load %arg8[%c0_52, %c0_53] : memref<96x32xf32, #tpu.memory_space<vmem>>, vector<96x32xf32>
    %cst_54 = arith.constant dense<0.000000e+00> : vector<16x32xf32>
    %196 = tpu.matmul %194, %195, %cst_54 {dimension_numbers = #tpu.dot_dimension_numbers<[1], [0], [0], [1], [0, 0, 1, 1], [], []>} : vector<16x96xf32>, vector<96x32xf32>, vector<16x32xf32> -> vector<16x32xf32>
    %c0_55 = arith.constant 0 : index
    %c0_56 = arith.constant 0 : index
    %197 = vector.load %arg9[%c0_55, %c0_56] : memref<1x32xf32, #tpu.memory_space<vmem>>, vector<1x32xf32>
    %198 = vector.broadcast %197 : vector<1x32xf32> to vector<16x32xf32>
    %199 = arith.addf %196, %198 : vector<16x32xf32>
    %200 = tpu.iota {dimensions = array<i32: 1>} : vector<16x32xi32>
    %c7_i32 = arith.constant 7 : i32
    %201 = vector.broadcast %c7_i32 : i32 to vector<16x32xi32>
    %202 = arith.cmpi eq, %200, %201 : vector<16x32xi32>
    %c8_i32 = arith.constant 8 : i32
    %203 = vector.broadcast %c8_i32 : i32 to vector<16x32xi32>
    %204 = arith.cmpi eq, %200, %203 : vector<16x32xi32>
    %205 = arith.ori %202, %204 : vector<16x32xi1>
    %206 = arith.mulf %199, %199 : vector<16x32xf32>
    %cst_57 = arith.constant 0.000000e+00 : f32
    %207 = vector.broadcast %cst_57 : f32 to vector<16x32xf32>
    %208 = arith.select %205, %206, %207 : vector<16x32xi1>, vector<16x32xf32>
    %cst_58 = arith.constant dense<0.000000e+00> : vector<16xf32>
    %209 = vector.multi_reduction <add>, %208, %cst_58 [1] : vector<16x32xf32> to vector<16xf32>
    %210 = vector.shape_cast %209 : vector<16xf32> to vector<16x1xf32>
    %cst_59 = arith.constant 1.000000e-24 : f32
    %211 = vector.broadcast %cst_59 : f32 to vector<16x1xf32>
    %212 = arith.maximumf %210, %211 : vector<16x1xf32>
    %213 = math.rsqrt %212 : vector<16x1xf32>
    %214 = vector.broadcast %213 : vector<16x1xf32> to vector<16x32xf32>
    %215 = arith.mulf %199, %214 : vector<16x32xf32>
    %216 = arith.select %205, %215, %199 : vector<16x32xi1>, vector<16x32xf32>
    %c0_60 = arith.constant 0 : index
    %c0_61 = arith.constant 0 : index
    %217 = vector.load %arg3[%c0_60, %c0_61] : memref<16x32xf32, #tpu.memory_space<vmem>>, vector<16x32xf32>
    %218 = arith.addf %216, %217 : vector<16x32xf32>
    %c0_62 = arith.constant 0 : index
    %c0_63 = arith.constant 0 : index
    %219 = vector.load %arg10[%c0_62, %c0_63] : memref<16x32xf32, #tpu.memory_space<vmem>>, vector<16x32xf32>
    tpu.vector_store %arg10[%c0_62, %c0_63], %218 {strides = array<i32>} : memref<16x32xf32, #tpu.memory_space<vmem>>, vector<16x32xf32>,
    return
  }
  func.func @transform_0(%arg0: i32) -> (i32, i32) {
    %c0_i32 = arith.constant 0 : i32
    %c0_i32_0 = arith.constant 0 : i32
    return %arg0, %c0_i32 : i32, i32
  }
  func.func @transform_1(%arg0: i32) -> (i32, i32) {
    %c0_i32 = arith.constant 0 : i32
    %c0_i32_0 = arith.constant 0 : i32
    return %arg0, %c0_i32 : i32, i32
  }
  func.func @transform_2(%arg0: i32) -> (i32, i32) {
    %c0_i32 = arith.constant 0 : i32
    %c0_i32_0 = arith.constant 0 : i32
    return %arg0, %c0_i32 : i32, i32
  }
  func.func @transform_3(%arg0: i32) -> (i32, i32) {
    %c0_i32 = arith.constant 0 : i32
    %c0_i32_0 = arith.constant 0 : i32
    %c0_i32_1 = arith.constant 0 : i32
    return %c0_i32, %c0_i32_0 : i32, i32
  }
  func.func @transform_4(%arg0: i32) -> (i32, i32) {
    %c0_i32 = arith.constant 0 : i32
    %c0_i32_0 = arith.constant 0 : i32
    %c0_i32_1 = arith.constant 0 : i32
    return %c0_i32, %c0_i32_0 : i32, i32
  }
  func.func @transform_5(%arg0: i32) -> (i32, i32) {
    %c0_i32 = arith.constant 0 : i32
    %c0_i32_0 = arith.constant 0 : i32
    %c0_i32_1 = arith.constant 0 : i32
    return %c0_i32, %c0_i32_0 : i32, i32
  }
  func.func @transform_6(%arg0: i32) -> (i32, i32) {
    %c0_i32 = arith.constant 0 : i32
    %c0_i32_0 = arith.constant 0 : i32
    %c0_i32_1 = arith.constant 0 : i32
    return %c0_i32, %c0_i32_0 : i32, i32
  }
  func.func @transform_7(%arg0: i32) -> (i32, i32) {
    %c0_i32 = arith.constant 0 : i32
    %c0_i32_0 = arith.constant 0 : i32
    %c0_i32_1 = arith.constant 0 : i32
    return %c0_i32, %c0_i32_0 : i32, i32
  }
  func.func @transform_8(%arg0: i32) -> (i32, i32) {
    %c0_i32 = arith.constant 0 : i32
    %c0_i32_0 = arith.constant 0 : i32
    %c0_i32_1 = arith.constant 0 : i32
    return %c0_i32, %c0_i32_0 : i32, i32
  }
  func.func @transform_9(%arg0: i32) -> (i32, i32) {
    %c0_i32 = arith.constant 0 : i32
    %c0_i32_0 = arith.constant 0 : i32
    return %arg0, %c0_i32 : i32, i32
  }
}

</mosaic_0001>

<bundles_post_ra>
// kernel: tpu_custom_call.1
= control target key start
LH: loop header
LB: loop body
LE: loop exit
PB: predicated region body
PF: predicated region fallthrough
CT: control target
= control target key end

     0   :  { %vm50_vm0 = vcmask 261120   ;;  %s1741_s0 = inlined_call_operand.vmem [shape: f32[16,32], index: 0, kind: input, shape index: {}]   ;;  %s1742_s1 = inlined_call_operand.vmem [shape: f32[16,32], index: 1, kind: input, shape index: {}]   ;;  %s1743_s2 = inlined_call_operand.vmem [shape: f32[16,32], index: 2, kind: input, shape index: {}]   ;;  %s1744_s3 = inlined_call_operand.vmem [shape: f32[32,96], index: 3, kind: input, shape index: {}]   ;;  %s1745_s4 = inlined_call_operand.vmem [shape: f32[1,96], index: 4, kind: input, shape index: {}]   ;;  %s1746_s5 = inlined_call_operand.vmem [shape: f32[160,32], index: 5, kind: input, shape index: {}]   ;;  %s1747_s6 = inlined_call_operand.vmem [shape: f32[24,32], index: 6, kind: input, shape index: {}]   ;;  %s1748_s7 = inlined_call_operand.vmem [shape: f32[96,32], index: 7, kind: input, shape index: {}]   ;;  %s1749_s8 = inlined_call_operand.vmem [shape: f32[1,32], index: 8, kind: input, shape index: {}]   ;;  %s1750_s9 = inlined_call_operand.hbm [shape: f32[16,32], index: 9, kind: output, shape index: {}]  }
   0x1   :  { %v39_v0 = vld [vmem:[%s1744_s3] sm:$0xff]  ;;  %v40_v1 = vld [vmem:[%s1744_s3 + $0x8] sm:$0xff]  ;;  %v41_v2 = vld [vmem:[%s1744_s3 + $0x10] sm:$0xff] }
   0x2   :  { %v1199_v3 = vpack.c.bf16 %v40_v1, %v39_v0  ;;  %v42_v4 = vld [vmem:[%s1744_s3 + $0x18] sm:$0xff]  ;;  %v33_v5 = vld [vmem:[%s1741_s0] sm:$0xff]  ;;  %v135_v10 = vld [vmem:[%s1746_s5 + $0x8] sm:$0xff] }
   0x3   :  { %v35_v6 = vld [vmem:[%s1742_s1] sm:$0xff]  ;;  %v1203_v7 = vpack.c.bf16 %v42_v4, %v41_v2 }
   0x4   :  { %v37_v8 = vadd.f32 %v35_v6, %v33_v5  ;;  %v134_v9 = vld [vmem:[%s1746_s5] sm:$0xff]  ;;  %1200 = vmatprep.subr.bf16.mxu1 %v1199_v3 }
   0x5   :  { %14 = vsyncpa [#allocation3], 0  ;;  %1202 = vmatpush3.bf16.msra.mxu1 %v1199_v3  ;;  %v34_v11 = vld [vmem:[%s1741_s0 + $0x8] sm:$0xff]  ;;  %v1207_v13 = vpack.c.bf16 %v135_v10, %v134_v9  ;;  %v136_v15 = vld [vmem:[%s1746_s5 + $0x10] sm:$0xff]  ;;  %s1329_s11 = smov 96   ;;  %v157_v25 = vlaneseq  ;;  %s1331_s10 = smov 32  }
   0x6   :  { %1114 = vmatprep.mubr.msk.f32.mxu1 %vm50_vm0, %v37_v8  ;;  %v36_v12 = vld [vmem:[%s1742_s1 + $0x8] sm:$0xff]  ;;  %1204 = vmatprep.subr.bf16.mxu1 %v1203_v7  ;;  %v137_v16 = vld [vmem:[%s1746_s5 + $0x18] sm:$0xff]  ;;  %v1040_v18 = vld [vmem:[%s1745_s4] ss:$0 sm:$0xff]  ;;  %s1330_s4 = smov 64   ;;  %vm891_vm1 = vcmask 523264  }
   0x7   :  { %v38_v14 = vadd.f32 %v36_v12, %v34_v11  ;;  %v1211_v17 = vpack.c.bf16 %v137_v16, %v136_v15  ;;  %v1441_v26 = vshrl.u32 %v157_v25, 7  ;;  %v1449_v28 = vld [vmem:[%s1747_s6] sm:$0xff]  ;;  %v139_v57 = vld [vmem:[%s1746_s5 + $0x28] sm:$0xff]  ;;  %v140_v59 = vld [vmem:[%s1746_s5 + $0x30] sm:$0xff]  ;;  %vm913_vm2 = vcmask 785408  }
   0x8   :  { %v138_v56 = vld [vmem:[%s1746_s5 + $0x20] sm:$0xff]  ;;  %v141_v60 = vld [vmem:[%s1746_s5 + $0x38] sm:$0xff] }
   0x9   :  { %1206 = vmatpush3.bf16.msra.mxu1 %v1203_v7  ;;  %v1444_v27 = vsub.s32 0, %v1441_v26  ;;  %v1215_v58 = vpack.c.bf16 %v139_v57, %v138_v56  ;;  %v1219_v61 = vpack.c.bf16 %v141_v60, %v140_v59  ;;  %v273_v10 = vsub.s32 1, %v1441_v26 }
   0xa   :  { %1208 = vmatprep.subr.bf16.mxu1 %v1207_v13 }
   0xb   :  { %v160_v29 = vrot.slane %v1449_v28, %v1444_v27  ;;  %1216 = vmatprep.subr.bf16.mxu0 %v1215_v58  ;;  %v274_v16 = vrot.slane %v1449_v28, %v273_v10 }
   0xc   :  { %1115 = vmatmul.mubr.msk.f32.vlgmr.msra.gmra.mrb[0].mxu1 %vm50_vm0, %v38_v14  ;;  %1218 = vmatpush3.bf16.msra.mxu0 %v1215_v58  ;;  %v285_v58 = vsub.s32 3, %v1441_v26 }
   0xd   :  { %1210 = vmatpush3.bf16.msra.mxu1 %v1207_v13  ;;  %1220 = vmatprep.subr.bf16.mxu0 %v1219_v61  ;;  %v279_v13 = vsub.s32 2, %v1441_v26 }
   0xe   :  { %1212 = vmatprep.subr.bf16.mxu1 %v1211_v17  ;;  %v286_v59 = vrot.slane %v1449_v28, %v285_v58 }
  0x10   :  { %1222 = vmatpush3.bf16.msra.mxu0 %v1219_v61 }
  0x11   :  { %1214 = vmatpush3.bf16.msra.mxu1 %v1211_v17 }
  0xdf   :  { %v1116_v19 = vpop.f32.mrb[0].mxu1 }
  0xe0   :  { %v129_v20 = vadd.f32 %v1116_v19, %v1040_v18  ;;  %v123_v21 = vpop.f32.mrb[1].mxu1 }
  0xe1   :  { %v124_v22 = vadd.f32 %v1040_v18, %v123_v21  ;;  %v280_v21 = vrot.slane %v1449_v28, %v279_v13 }
  0xe2   :  { %v1428_v24 = vmax.f32 %v129_v20, 0.0 }
  0xe3   :  { %v1426_v23 = vmax.f32 %v124_v22, 0.0 }
  0xe5   :  { %495 = vrot.lane.b32.xlu1 %v1426_v23, %s1329_s11  ;;  %1125 = vmatprep.mubr.msk.f32.mxu1 %vm50_vm0, %v1426_v23 }
  0xe6   :  { %1126 = vmatmul.mubr.msk.f32.vlgmr.msra.gmra.mrb[2].mxu1 %vm50_vm0, %v1428_v24 }
  0xe9   :  { %497 = vrot.lane.b32.xlu1 %v1428_v24, %s1329_s11 }
  0xed   :  { %686 = vrot.lane.b32.xlu1 %v1428_v24, %s1330_s4 }
 0x157   :  { %v496_v44 = vpop.permute.xlu1 %495 }
 0x158   :  { %v501_v48 = vsel %vm50_vm0, %v496_v44, 0.0 }
 0x15b   :  { %v498_v50 = vpop.permute.xlu1 %497 }
 0x15c   :  { %v504_v51 = vsel %vm50_vm0, %v498_v50, 0.0  ;;  %v537_v50 = vsub.s32 7, %v1441_v26 }
 0x15f   :  { %v687_v54 = vpop.permute.xlu1 %686 }
 0x160   :  { %v693_v55 = vsel %vm50_vm0, %v687_v54, 0.0  ;;  %v485_v54 = vsub.s32 5, %v1441_v26 }
 0x1b9   :  { %v1127_v30 = vpop.f32.mrb[2].mxu1 }
 0x1ba   :  { %v233_v31 = vpop.f32.mrb[3].mxu1  ;;  %v239_v32 = vadd.f32 %v1127_v30, %v160_v29 }
 0x1bb   :  { %v234_v33 = vadd.f32 %v233_v31, %v160_v29 }
 0x1bc   :  { %v243_v35 = vmax.f32 %v239_v32, 0.0 }
 0x1bd   :  { %v242_v34 = vmax.f32 %v234_v33, 0.0 }
 0x1be   :  { %v247_v37 = vsel %vm50_vm0, %v243_v35, 0.0 }
 0x1bf   :  { %v244_v36 = vsel %vm50_vm0, %v242_v34, 0.0 }
 0x1c0   :  { %245 = vadd.xlane.f32.xlu0 %v244_v36 }
 0x1c4   :  { %248 = vadd.xlane.f32.xlu0 %v247_v37  ;;  %v143_v37 = vld [vmem:[%s1746_s5 + $0x48] sm:$0xff] }
 0x1da   :  { %684 = vrot.lane.b32.xlu0 %v1426_v23, %s1330_s4 }
 0x24d   :  { %v246_v38 = vpop.xlane.xlu0 %245 }
 0x24e   :  { %v251_v39 = vmul.f32 0.03125, %v246_v38 }
 0x250   :  { %v253_v40 = vsub.f32 %v242_v34, %v251_v39  ;;  %v144_v39 = vld [vmem:[%s1746_s5 + $0x50] sm:$0xff] }
 0x251   :  { %v249_v41 = vpop.xlane.xlu0 %248 }
 0x252   :  { %v252_v42 = vmul.f32 0.03125, %v249_v41  ;;  %v255_v43 = vmul.f32 %v253_v40, %v253_v40 }
 0x254   :  { %v254_v45 = vsub.f32 %v243_v35, %v252_v42  ;;  %v257_v46 = vsel %vm50_vm0, %v255_v43, 0.0 }
 0x255   :  { %258 = vadd.xlane.f32.xlu1 %v257_v46  ;;  %v685_v52 = vpop.permute.xlu0 %684 }
 0x256   :  { %v256_v47 = vmul.f32 %v254_v45, %v254_v45  ;;  %v690_v53 = vsel %vm50_vm0, %v685_v52, 0.0  ;;  %v1530_v52 = vld [vmem:[%s1747_s6 + $0x8] sm:$0xff] }
 0x257   :  { %v737_v56 = vrot.slane %v1530_v52, %v485_v54  ;;  %v548_v57 = vrot.slane %v1530_v52, %v1444_v27 }
 0x258   :  { %v260_v49 = vsel %vm50_vm0, %v256_v47, 0.0 }
 0x259   :  { %502 = vadd.xlane.f32.xlu1 %v501_v48  ;;  %261 = vadd.xlane.f32.xlu0 %v260_v49 }
 0x25d   :  { %505 = vadd.xlane.f32.xlu1 %v504_v51  ;;  %v372_v51 = vsub.s32 4, %v1441_v26 }
 0x261   :  { %691 = vadd.xlane.f32.xlu1 %v690_v53  ;;  %v538_v53 = vrot.slane %v1449_v28, %v537_v50 }
 0x265   :  { %694 = vadd.xlane.f32.xlu1 %v693_v55  ;;  %v727_v55 = vrot.slane %v1530_v52, %v372_v51 }
 0x2e2   :  { %v259_v62 = vpop.xlane.xlu1 %258 }
 0x2e3   :  { %v263_v63 = vmul.f32 0.03125, %v259_v62 }
 0x2e5   :  { %v265_v0 = vadd.f32 1e-05, %v263_v63 }
 0x2e6   :  { %v503_v1 = vpop.xlane.xlu1 %502  ;;  %v262_v2 = vpop.xlane.xlu0 %261 }
 0x2e7   :  { %1277 = vrsqrt.f32 %v265_v0  ;;  %v507_v3 = vmul.f32 0.03125, %v503_v1  ;;  %v264_v4 = vmul.f32 0.03125, %v262_v2 }
 0x2e9   :  { %v1476_v5 = vsub.f32 %v1426_v23, %v507_v3  ;;  %v266_v6 = vadd.f32 1e-05, %v264_v4 }
 0x2ea   :  { %v506_v7 = vpop.xlane.xlu1 %505 }
 0x2eb   :  { %1279 = vrsqrt.f32 %v266_v6  ;;  %v508_v8 = vmul.f32 0.03125, %v506_v7  ;;  %v511_v9 = vmul.f32 %v1476_v5, %v1476_v5 }
 0x2ed   :  { %v1482_v11 = vsub.f32 %v1428_v24, %v508_v8  ;;  %515 = vrot.lane.b32.xlu0 %v511_v9, %s1329_s11 }
 0x2ee   :  { %v692_v12 = vpop.xlane.xlu1 %691 }
 0x2ef   :  { %v696_v14 = vmul.f32 0.03125, %v692_v12  ;;  %v512_v15 = vmul.f32 %v1482_v11, %v1482_v11  ;;  %v146_v12 = vld [vmem:[%s1746_s5 + $0x60] sm:$0xff] }
 0x2f1   :  { %v1278_v17 = vpop.eup %1277  ;;  %v1492_v18 = vsub.f32 %v1426_v23, %v696_v14  ;;  %517 = vrot.lane.b32.xlu1 %v512_v15, %s1329_s11  ;;  %v147_v14 = vld [vmem:[%s1746_s5 + $0x68] sm:$0xff] }
 0x2f2   :  { %v695_v19 = vpop.xlane.xlu1 %694  ;;  %v269_v20 = vmul.f32 %v1278_v17, %v253_v40  ;;  %v145_v40 = vld [vmem:[%s1746_s5 + $0x58] sm:$0xff]  ;;  %v1231_v15 = vpack.c.bf16 %v147_v14, %v146_v12 }
 0x2f3   :  { %v697_v22 = vmul.f32 0.03125, %v695_v19  ;;  %v700_v29 = vmul.f32 %v1492_v18, %v1492_v18  ;;  %v1227_v41 = vpack.c.bf16 %v145_v40, %v144_v39  ;;  %v153_v39 = vld [vmem:[%s1746_s5 + $0x98] sm:$0xff] }
 0x2f4   :  { %v275_v30 = vmul.f32 %v274_v16, %v269_v20  ;;  %1232 = vmatprep.subr.bf16.mxu0 %v1231_v15 }
 0x2f5   :  { %v1280_v31 = vpop.eup %1279  ;;  %v1501_v32 = vsub.f32 %v1428_v24, %v697_v22  ;;  %704 = vrot.lane.b32.xlu1 %v700_v29, %s1330_s4  ;;  %v142_v24 = vld [vmem:[%s1746_s5 + $0x40] sm:$0xff] }
 0x2f6   :  { %v270_v23 = vmul.f32 %v1280_v31, %v254_v45  ;;  %v281_v33 = vadd.f32 %v280_v21, %v275_v30  ;;  %v1223_v38 = vpack.c.bf16 %v143_v37, %v142_v24  ;;  %v148_v30 = vld [vmem:[%s1746_s5 + $0x70] sm:$0xff]  ;;  %v149_v31 = vld [vmem:[%s1746_s5 + $0x78] sm:$0xff] }
 0x2f7   :  { %v701_v34 = vmul.f32 %v1501_v32, %v1501_v32 }
 0x2f8   :  { %v276_v35 = vmul.f32 %v274_v16, %v270_v23  ;;  %1136 = vmatprep.mubr.msk.f32.mxu0 %vm50_vm0, %v281_v33  ;;  %1224 = vmatprep.subr.bf16.mxu1 %v1223_v38  ;;  %v150_v23 = vld [vmem:[%s1746_s5 + $0x80] sm:$0xff] }
 0x2f9   :  { %706 = vrot.lane.b32.xlu0 %v701_v34, %s1330_s4  ;;  %1226 = vmatpush3.bf16.msra.mxu1 %v1223_v38  ;;  %v152_v38 = vld [vmem:[%s1746_s5 + $0x90] sm:$0xff] }
 0x2fa   :  { %v282_v36 = vadd.f32 %v280_v21, %v276_v35  ;;  %1228 = vmatprep.subr.bf16.mxu1 %v1227_v41  ;;  %v1235_v35 = vpack.c.bf16 %v149_v31, %v148_v30  ;;  %v1243_v40 = vpack.c.bf16 %v153_v39, %v152_v38 }
 0x2fc   :  { %1137 = vmatmul.mubr.msk.f32.vlgmr.msra.gmra.mrb[0].mxu0 %vm50_vm0, %v282_v36  ;;  %v151_v36 = vld [vmem:[%s1746_s5 + $0x88] sm:$0xff] }
 0x2fd   :  { %1230 = vmatpush3.bf16.msra.mxu1 %v1227_v41  ;;  %1234 = vmatpush3.bf16.msra.mxu0 %v1231_v15  ;;  %v1239_v24 = vpack.c.bf16 %v151_v36, %v150_v23 }
 0x2fe   :  { %1236 = vmatprep.subr.bf16.mxu0 %v1235_v35 }
 0x2ff   :  { %1240 = vmatprep.subr.bf16.mxu1 %v1239_v24 }
 0x301   :  { %1238 = vmatpush3.bf16.msra.mxu0 %v1235_v35 }
 0x35f   :  { %v516_v44 = vpop.permute.xlu0 %515 }
 0x360   :  { %v521_v49 = vsel %vm50_vm0, %v516_v44, 0.0 }
 0x363   :  { %v518_v42 = vpop.permute.xlu1 %517 }
 0x364   :  { %v524_v43 = vsel %vm50_vm0, %v518_v42, 0.0 }
 0x365   :  { %525 = vadd.xlane.f32.xlu0 %v524_v43 }
 0x367   :  { %v705_v45 = vpop.permute.xlu1 %704 }
 0x368   :  { %v710_v46 = vsel %vm50_vm0, %v705_v45, 0.0 }
 0x369   :  { %711 = vadd.xlane.f32.xlu0 %v710_v46 }
 0x36b   :  { %v707_v47 = vpop.permute.xlu0 %706 }
 0x36c   :  { %v713_v48 = vsel %vm50_vm0, %v707_v47, 0.0 }
 0x36d   :  { %714 = vadd.xlane.f32.xlu1 %v713_v48 }
 0x371   :  { %522 = vadd.xlane.f32.xlu1 %v521_v49 }
 0x37f   :  { %540 = vrot.lane.b32.xlu0 %v538_v53, %s1331_s10 }
 0x382   :  { %729 = vrot.lane.b32.xlu1 %v727_v55, %s1330_s4 }
 0x383   :  { %739 = vrot.lane.b32.xlu0 %v737_v56, %s1330_s4 }
 0x386   :  { %550 = vrot.lane.b32.xlu1 %v548_v57, %s1331_s10 }
 0x3cf   :  { %v1138_v60 = vpop.f32.mrb[0].mxu0 }
 0x3d0   :  { %v365_v61 = vadd.f32 %v1138_v60, %v286_v59  ;;  %v359_v62 = vpop.f32.mrb[1].mxu0 }
 0x3d1   :  { %v360_v63 = vadd.f32 %v359_v62, %v286_v59 }
 0x3d2   :  { %v369_v1 = vmax.f32 %v365_v61, 0.0 }
 0x3d3   :  { %v368_v0 = vmax.f32 %v360_v63, 0.0  ;;  %v558_v63 = vrot.slane %v1530_v52, %v273_v10 }
 0x3d5   :  { %1147 = vmatprep.mubr.msk.f32.mxu1 %vm50_vm0, %v368_v0  ;;  %v491_v0 = vsub.s32 6, %v1441_v26 }
 0x3d6   :  { %1148 = vmatmul.mubr.msk.f32.vlgmr.msra.gmra.mrb[4].mxu1 %vm50_vm0, %v369_v1 }
 0x3d7   :  { %1242 = vmatpush3.bf16.msra.mxu1 %v1239_v24 }
 0x3d8   :  { %1244 = vmatprep.subr.bf16.mxu1 %v1243_v40 }
 0x3db   :  { %1246 = vmatpush3.bf16.msra.mxu1 %v1243_v40 }
 0x3f2   :  { %v526_v2 = vpop.xlane.xlu0 %525 }
 0x3f3   :  { %v528_v3 = vmul.f32 0.03125, %v526_v2 }
 0x3f5   :  { %v530_v4 = vadd.f32 1e-05, %v528_v3 }
 0x3f6   :  { %v712_v6 = vpop.xlane.xlu0 %711 }
 0x3f7   :  { %1281 = vrsqrt.f32 %v530_v4  ;;  %v716_v7 = vmul.f32 0.03125, %v712_v6  ;;  %v747_v4 = vrot.slane %v1530_v52, %v491_v0  ;;  %v373_v6 = vrot.slane %v1449_v28, %v372_v51 }
 0x3f9   :  { %v718_v16 = vadd.f32 1e-05, %v716_v7 }
 0x3fa   :  { %v715_v8 = vpop.xlane.xlu1 %714  ;;  %v541_v29 = vpop.permute.xlu0 %540 }
 0x3fb   :  { %v717_v9 = vmul.f32 0.03125, %v715_v8 }
 0x3fd   :  { %v719_v17 = vadd.f32 1e-05, %v717_v9 }
 0x3fe   :  { %v523_v19 = vpop.xlane.xlu1 %522  ;;  %v740_v47 = vpop.permute.xlu0 %739 }
 0x3ff   :  { %1283 = vrsqrt.f32 %v719_v17  ;;  %v527_v20 = vmul.f32 0.03125, %v523_v19 }
 0x400   :  { %1285 = vrsqrt.f32 %v718_v16 }
 0x401   :  { %v1282_v21 = vpop.eup %1281  ;;  %v529_v22 = vadd.f32 1e-05, %v527_v20 }
 0x402   :  { %v730_v33 = vpop.permute.xlu1 %729  ;;  %v534_v34 = vmul.f32 %v1282_v21, %v1482_v11 }
 0x403   :  { %1287 = vrsqrt.f32 %v529_v22 }
 0x404   :  { %v544_v37 = vmul.f32 %v541_v29, %v534_v34 }
 0x406   :  { %v551_v11 = vpop.permute.xlu1 %550 }
 0x407   :  { %v554_v41 = vadd.f32 %v551_v11, %v544_v37 }
 0x409   :  { %v1284_v42 = vpop.eup %1283  ;;  %563 = vrot.lane.b32.xlu0 %v554_v41, %s1329_s11 }
 0x40a   :  { %v723_v43 = vmul.f32 %v1284_v42, %v1501_v32  ;;  %v1286_v44 = vpop.eup %1285 }
 0x40b   :  { %v722_v48 = vmul.f32 %v1286_v44, %v1492_v18 }
 0x40c   :  { %v733_v45 = vmul.f32 %v730_v33, %v723_v43 }
 0x40d   :  { %v1288_v46 = vpop.eup %1287  ;;  %v732_v56 = vmul.f32 %v730_v33, %v722_v48 }
 0x40e   :  { %v533_v49 = vmul.f32 %v1288_v46, %v1476_v5  ;;  %v743_v53 = vadd.f32 %v740_v47, %v733_v45 }
 0x40f   :  { %v742_v59 = vadd.f32 %v740_v47, %v732_v56 }
 0x410   :  { %v543_v55 = vmul.f32 %v541_v29, %v533_v49  ;;  %752 = vrot.lane.b32.xlu0 %v743_v53, %s1330_s4 }
 0x412   :  { %v553_v57 = vadd.f32 %v551_v11, %v543_v55 }
 0x414   :  { %561 = vrot.lane.b32.xlu1 %v553_v57, %s1329_s11  ;;  %s1332_s11 = smov [#allocation2]  }
 0x415   :  { %s1029_s25 = sshll.u32 %s1332_s11, 4  ;;  %s1030_s25 = int_to_ptr.vmem [resolvable:$true] %s1029_s25 }
 0x416   :  { %s1305_s28 = scalar_lea.vmem %s1030_s25, 256  ;;  %p1310_p1 = scmp.lt.s32.totalorder %s1030_s25, %s1030_s25 }
 0x417   :  { %p1306_p0 = scmp.ne.s32.totalorder %s1030_s25, %s1305_s28  ;;  %p1311_p2 = scmp.lt.s32.totalorder %s1305_s28, %s1305_s28 }
 0x418   :  { %750 = vrot.lane.b32.xlu1 %v742_v59, %s1330_s4 }
 0x419   :  { %p1312_p3 = por %p1311_p2, %p1310_p1 }
 0x41b   :  { %p1313_p4 = pnand %p1312_p3, %p1306_p0 }
 0x47b   :  { %v564_v60 = vpop.permute.xlu0 %563 }
 0x482   :  { %v753_v61 = vpop.permute.xlu0 %752 }
 0x486   :  { %v562_v32 = vpop.permute.xlu1 %561 }
 0x487   :  { %1158 = vmatprep.mubr.msk.f32.mxu0 %vm50_vm0, %v562_v32 }
 0x488   :  { %1159 = vmatmul.mubr.msk.f32.vlgmr.msra.gmra.mrb[2].mxu0 %vm50_vm0, %v564_v60 }
 0x48a   :  { %v751_v18 = vpop.permute.xlu1 %750 }
 0x48b   :  { %1169 = vmatprep.mubr.msk.f32.mxu1 %vm50_vm0, %v751_v18 }
 0x48c   :  { %1170 = vmatmul.mubr.msk.f32.vlgmr.msra.gmra.mrb[6].mxu1 %vm50_vm0, %v753_v61 }
 0x4a9   :  { %v1149_v5 = vpop.f32.mrb[4].mxu1 }
 0x4aa   :  { %v446_v62 = vpop.f32.mrb[5].mxu1  ;;  %v452_v16 = vadd.f32 %v1149_v5, %v373_v6 }
 0x4ab   :  { %v447_v17 = vadd.f32 %v446_v62, %v373_v6  ;;  %v897_v6 = vld [vmem:[%s1748_s7 + $0x18] sm:$0xff] }
 0x4ac   :  { %v456_v51 = vmax.f32 %v452_v16, 0.0  ;;  %v902_v16 = vld [vmem:[%s1748_s7 + $0x40] sm:$0xff] }
 0x4ad   :  { %v455_v30 = vmax.f32 %v447_v17, 0.0  ;;  %v903_v17 = vld [vmem:[%s1748_s7 + $0x48] sm:$0xff] }
 0x4ae   :  { %v460_v23 = vsel %vm50_vm0, %v456_v51, 0.0 }
 0x4af   :  { %v457_v33 = vsel %vm50_vm0, %v455_v30, 0.0 }
 0x55b   :  { %v1160_v1 = vpop.f32.mrb[2].mxu0 }
 0x55c   :  { %v641_v2 = vadd.f32 %v1160_v1, %v558_v63  ;;  %v635_v3 = vpop.f32.mrb[3].mxu0  ;;  %v894_v1 = vld [vmem:[%s1748_s7] sm:$0xff] }
 0x55d   :  { %v636_v7 = vadd.f32 %v635_v3, %v558_v63  ;;  %v896_v3 = vld [vmem:[%s1748_s7 + $0x10] sm:$0xff] }
 0x55e   :  { %v645_v8 = vmax.f32 %v641_v2, 0.0  ;;  %v895_v2 = vld [vmem:[%s1748_s7 + $0x8] sm:$0xff] }
 0x55f   :  { %v644_v9 = vmax.f32 %v636_v7, 0.0  ;;  %v1171_v12 = vpop.f32.mrb[6].mxu1  ;;  %v1251_v7 = vpack.c.bf16 %v897_v6, %v896_v3 }
 0x560   :  { %v830_v14 = vadd.f32 %v1171_v12, %v747_v4  ;;  %v824_v15 = vpop.f32.mrb[7].mxu1  ;;  %v649_v10 = vsel %vm50_vm0, %v645_v8, 0.0 }
 0x561   :  { %v825_v19 = vadd.f32 %v824_v15, %v747_v4  ;;  %650 = vadd.xlane.f32.xlu0 %v649_v10  ;;  %v646_v20 = vsel %vm50_vm0, %v644_v9, 0.0  ;;  %v1247_v4 = vpack.c.bf16 %v895_v2, %v894_v1  ;;  %v901_v15 = vld [vmem:[%s1748_s7 + $0x38] sm:$0xff]  ;;  %v486_v2 = vrot.slane %v1449_v28, %v485_v54 }
 0x562   :  { %v834_v21 = vmax.f32 %v830_v14, 0.0  ;;  %647 = vadd.xlane.f32.xlu1 %v646_v20  ;;  %v900_v14 = vld [vmem:[%s1748_s7 + $0x30] sm:$0xff] }
 0x563   :  { %v833_v22 = vmax.f32 %v825_v19, 0.0  ;;  %1248 = vmatprep.subr.bf16.mxu0 %v1247_v4  ;;  %v1259_v10 = vpack.c.bf16 %v901_v15, %v900_v14  ;;  %v1263_v19 = vpack.c.bf16 %v903_v17, %v902_v16  ;;  %v996_v16 = vand.u32 127, %v157_v25  ;;  %v1053_v17 = vld [vmem:[%s1749_s8] ss:$0 sm:$0xff] }
 0x564   :  { %v838_v29 = vsel %vm50_vm0, %v834_v21, 0.0  ;;  %1250 = vmatpush3.bf16.msra.mxu0 %v1247_v4 }
 0x565   :  { %v835_v31 = vsel %vm50_vm0, %v833_v22, 0.0  ;;  %1252 = vmatprep.subr.bf16.mxu0 %v1251_v7  ;;  %vm997_vm3 = vcmp.eq.s32.totalorder %v996_v16, 7  ;;  %vm998_vm4 = vcmp.eq.s32.totalorder %v996_v16, 8 }
 0x566   :  { %839 = vadd.xlane.f32.xlu1 %v838_v29  ;;  %836 = vadd.xlane.f32.xlu0 %v835_v31  ;;  %vm1707_vm5 = vmor %vm997_vm3, %vm998_vm4 }
 0x568   :  { %1254 = vmatpush3.bf16.msra.mxu0 %v1251_v7 }
 0x56a   :  { %461 = vadd.xlane.f32.xlu1 %v460_v23  ;;  %458 = vadd.xlane.f32.xlu0 %v457_v33 }
 0x5ee   :  { %v651_v34 = vpop.xlane.xlu0 %650 }
 0x5ef   :  { %v653_v35 = vmul.f32 0.03125, %v651_v34  ;;  %v648_v36 = vpop.xlane.xlu1 %647 }
 0x5f0   :  { %v652_v24 = vmul.f32 0.03125, %v648_v36 }
 0x5f1   :  { %v1606_v37 = vsub.f32 %v645_v8, %v653_v35  ;;  %v898_v8 = vld [vmem:[%s1748_s7 + $0x20] sm:$0xff] }
 0x5f2   :  { %v1608_v38 = vsub.f32 %v644_v9, %v652_v24  ;;  %v899_v9 = vld [vmem:[%s1748_s7 + $0x28] sm:$0xff] }
 0x5f3   :  { %v840_v39 = vpop.xlane.xlu1 %839  ;;  %v837_v11 = vpop.xlane.xlu0 %836  ;;  %v657_v40 = vmul.f32 %v1606_v37, %v1606_v37  ;;  %v1255_v12 = vpack.c.bf16 %v899_v9, %v898_v8 }
 0x5f4   :  { %v842_v41 = vmul.f32 0.03125, %v840_v39  ;;  %v841_v42 = vmul.f32 0.03125, %v837_v11  ;;  %v656_v43 = vmul.f32 %v1608_v38, %v1608_v38 }
 0x5f5   :  { %v661_v44 = vsel %vm50_vm0, %v657_v40, 0.0  ;;  %1256 = vmatprep.subr.bf16.mxu0 %v1255_v12 }
 0x5f6   :  { %v1615_v45 = vsub.f32 %v834_v21, %v842_v41  ;;  %v1617_v46 = vsub.f32 %v833_v22, %v841_v42  ;;  %662 = vadd.xlane.f32.xlu1 %v661_v44  ;;  %v658_v47 = vsel %vm50_vm0, %v656_v43, 0.0  ;;  %1258 = vmatpush3.bf16.msra.mxu0 %v1255_v12  ;;  %v904_v41 = vld [vmem:[%s1748_s7 + $0x50] sm:$0xff]  ;;  %v905_v42 = vld [vmem:[%s1748_s7 + $0x58] sm:$0xff] }
 0x5f7   :  { %v462_v48 = vpop.xlane.xlu1 %461  ;;  %659 = vadd.xlane.f32.xlu0 %v658_v47  ;;  %v459_v49 = vpop.xlane.xlu0 %458  ;;  %1260 = vmatprep.subr.bf16.mxu0 %v1259_v10  ;;  %v1267_v43 = vpack.c.bf16 %v905_v42, %v904_v41  ;;  %v1019_v41 = vld [vmem:[%s1743_s2 + $0x8] sm:$0xff] }
 0x5f8   :  { %v464_v53 = vmul.f32 0.03125, %v462_v48  ;;  %v463_v55 = vmul.f32 0.03125, %v459_v49  ;;  %v846_v56 = vmul.f32 %v1615_v45, %v1615_v45  ;;  %v845_v57 = vmul.f32 %v1617_v46, %v1617_v46 }
 0x5f9   :  { %v675_v48 = vrot.slane %v1530_v52, %v279_v13  ;;  %v864_v13 = vrot.slane %v1530_v52, %v537_v50 }
 0x5fa   :  { %v1624_v59 = vsub.f32 %v456_v51, %v464_v53  ;;  %v1626_v32 = vsub.f32 %v455_v30, %v463_v55  ;;  %v850_v60 = vsel %vm50_vm0, %v846_v56, 0.0  ;;  %v847_v18 = vsel %vm50_vm0, %v845_v57, 0.0  ;;  %1262 = vmatpush3.bf16.msra.mxu0 %v1259_v10 }
 0x5fb   :  { %851 = vadd.xlane.f32.xlu1 %v850_v60  ;;  %848 = vadd.xlane.f32.xlu0 %v847_v18  ;;  %v681_v56 = vrot.slane %v1530_v52, %v285_v58  ;;  %v156_v18 = vld [vmem:[%s1747_s6 + $0x10] sm:$0xff] }
 0x5fc   :  { %v468_v61 = vmul.f32 %v1624_v59, %v1624_v59  ;;  %v467_v5 = vmul.f32 %v1626_v32, %v1626_v32  ;;  %1264 = vmatprep.subr.bf16.mxu0 %v1263_v19  ;;  %v870_v58 = vrot.slane %v156_v18, %v1444_v27 }
 0x5fe   :  { %v472_v62 = vsel %vm50_vm0, %v468_v61, 0.0  ;;  %v469_v63 = vsel %vm50_vm0, %v467_v5, 0.0  ;;  %1266 = vmatpush3.bf16.msra.mxu0 %v1263_v19 }
 0x5ff   :  { %473 = vadd.xlane.f32.xlu1 %v472_v62  ;;  %470 = vadd.xlane.f32.xlu0 %v469_v63 }
 0x600   :  { %1268 = vmatprep.subr.bf16.mxu0 %v1267_v43 }
 0x602   :  { %1270 = vmatpush3.bf16.msra.mxu0 %v1267_v43  ;;  %v1018_v43 = vld [vmem:[%s1743_s2] sm:$0xff] }
 0x683   :  { %v663_v20 = vpop.xlane.xlu1 %662 }
 0x684   :  { %v665_v21 = vmul.f32 0.03125, %v663_v20  ;;  %v660_v22 = vpop.xlane.xlu0 %659 }
 0x685   :  { %v664_v29 = vmul.f32 0.03125, %v660_v22 }
 0x686   :  { %v667_v51 = vadd.f32 1e-05, %v665_v21 }
 0x687   :  { %v666_v30 = vadd.f32 1e-05, %v664_v29 }
 0x688   :  { %1289 = vrsqrt.f32 %v667_v51  ;;  %v852_v31 = vpop.xlane.xlu1 %851  ;;  %v849_v23 = vpop.xlane.xlu0 %848 }
 0x689   :  { %1291 = vrsqrt.f32 %v666_v30  ;;  %v854_v33 = vmul.f32 0.03125, %v852_v31  ;;  %v853_v34 = vmul.f32 0.03125, %v849_v23 }
 0x68b   :  { %v856_v35 = vadd.f32 1e-05, %v854_v33  ;;  %v855_v36 = vadd.f32 1e-05, %v853_v34 }
 0x68c   :  { %v474_v24 = vpop.xlane.xlu1 %473  ;;  %v471_v39 = vpop.xlane.xlu0 %470 }
 0x68d   :  { %1293 = vrsqrt.f32 %v856_v35  ;;  %v476_v11 = vmul.f32 0.03125, %v474_v24  ;;  %v475_v40 = vmul.f32 0.03125, %v471_v39 }
 0x68e   :  { %1295 = vrsqrt.f32 %v855_v36 }
 0x68f   :  { %v478_v44 = vadd.f32 1e-05, %v476_v11  ;;  %v477_v47 = vadd.f32 1e-05, %v475_v40 }
 0x691   :  { %1297 = vrsqrt.f32 %v478_v44 }
 0x692   :  { %v1290_v49 = vpop.eup %1289  ;;  %1299 = vrsqrt.f32 %v477_v47 }
 0x693   :  { %v1292_v53 = vpop.eup %1291  ;;  %v671_v55 = vmul.f32 %v1290_v49, %v1606_v37 }
 0x694   :  { %v670_v57 = vmul.f32 %v1292_v53, %v1608_v38 }
 0x695   :  { %v677_v60 = vmul.f32 %v675_v48, %v671_v55 }
 0x696   :  { %v676_v61 = vmul.f32 %v675_v48, %v670_v57 }
 0x697   :  { %v1294_v5 = vpop.eup %1293  ;;  %v683_v62 = vadd.f32 %v681_v56, %v677_v60 }
 0x698   :  { %v1296_v63 = vpop.eup %1295  ;;  %v682_v37 = vadd.f32 %v681_v56, %v676_v61  ;;  %v860_v1 = vmul.f32 %v1294_v5, %v1615_v45  ;;  %v492_v45 = vrot.slane %v1449_v28, %v491_v0 }
 0x699   :  { %877 = vrot.lane.b32.xlu1 %v683_v62, %s1331_s10  ;;  %v859_v38 = vmul.f32 %v1296_v63, %v1617_v46 }
 0x69a   :  { %875 = vrot.lane.b32.xlu0 %v682_v37, %s1331_s10  ;;  %v866_v3 = vmul.f32 %v864_v13, %v860_v1 }
 0x69b   :  { %v1298_v50 = vpop.eup %1297  ;;  %v865_v52 = vmul.f32 %v864_v13, %v859_v38 }
 0x69c   :  { %v1300_v4 = vpop.eup %1299  ;;  %v872_v6 = vadd.f32 %v870_v58, %v866_v3  ;;  %v482_v27 = vmul.f32 %v1298_v50, %v1624_v59 }
 0x69d   :  { %v871_v7 = vadd.f32 %v870_v58, %v865_v52  ;;  %v481_v46 = vmul.f32 %v1300_v4, %v1626_v32 }
 0x69e   :  { %885 = vrot.lane.b32.xlu0 %v872_v6, %s1330_s4  ;;  %v488_v8 = vmul.f32 %v486_v2, %v482_v27 }
 0x69f   :  { %883 = vrot.lane.b32.xlu1 %v871_v7, %s1330_s4  ;;  %v487_v54 = vmul.f32 %v486_v2, %v481_v46 }
 0x6a0   :  { %v494_v9 = vadd.f32 %v492_v45, %v488_v8 }
 0x6a1   :  { %v493_v12 = vadd.f32 %v492_v45, %v487_v54 }
 0x70b   :  { %v878_v14 = vpop.permute.xlu1 %877 }
 0x70c   :  { %v876_v15 = vpop.permute.xlu0 %875  ;;  %v890_v26 = vsel %vm50_vm0, %v494_v9, %v878_v14 }
 0x70d   :  { %v889_v0 = vsel %vm50_vm0, %v493_v12, %v876_v15 }
 0x710   :  { %v886_v28 = vpop.permute.xlu0 %885 }
 0x711   :  { %v884_v59 = vpop.permute.xlu1 %883  ;;  %v893_v10 = vsel %vm891_vm1, %v890_v26, %v886_v28 }
 0x712   :  { %v892_v32 = vsel %vm891_vm1, %v889_v0, %v884_v59 }
 0x713   :  { %1196 = vmatprep.mubr.msk.f32.mxu0 %vm913_vm2, %v892_v32 }
 0x714   :  { %1197 = vmatmul.mubr.msk.f32.vlgmr.msra.gmra.mrb[4].mxu0 %vm913_vm2, %v893_v10 }
 0x7e7   :  { %v1198_v19 = vpop.f32.mrb[4].mxu0 }
 0x7e8   :  { %v992_v20 = vadd.f32 %v1198_v19, %v1053_v17  ;;  %v986_v21 = vpop.f32.mrb[5].mxu0 }
 0x7e9   :  { %v987_v22 = vadd.f32 %v1053_v17, %v986_v21 }
 0x7ea   :  { %v1001_v51 = vmul.f32 %v992_v20, %v992_v20 }
 0x7eb   :  { %v1000_v30 = vmul.f32 %v987_v22, %v987_v22 }
 0x7ec   :  { %v1003_v31 = vsel %vm1707_vm5, %v1001_v51, 0.0 }
 0x7ed   :  { %v1007_v25 = vsel %vm50_vm0, %v1003_v31, 0.0  ;;  %v1002_v23 = vsel %vm1707_vm5, %v1000_v30, 0.0 }
 0x7ee   :  { %1008 = vadd.xlane.f32.xlu0 %v1007_v25  ;;  %v1004_v33 = vsel %vm50_vm0, %v1002_v23, 0.0 }
 0x7ef   :  { %1005 = vadd.xlane.f32.xlu1 %v1004_v33 }
 0x87b   :  { %v1009_v34 = vpop.xlane.xlu0 %1008 }
 0x87c   :  { %v1011_v35 = vmax.f32 %v1009_v34, 1e-24  ;;  %v1006_v36 = vpop.xlane.xlu1 %1005 }
 0x87d   :  { %v1010_v24 = vmax.f32 %v1006_v36, 1e-24 }
 0x87e   :  { %1301 = vrsqrt.f32 %v1011_v35 }
 0x87f   :  { %1303 = vrsqrt.f32 %v1010_v24 }
 0x888   :  { %v1302_v39 = vpop.eup %1301 }
 0x889   :  { %v1304_v11 = vpop.eup %1303  ;;  %v1015_v40 = vmul.f32 %v1302_v39, %v992_v20 }
 0x88a   :  { %v1014_v42 = vmul.f32 %v1304_v11, %v987_v22 }
 0x88b   :  { %v1017_v44 = vsel %vm1707_vm5, %v1015_v40, %v992_v20 }
 0x88c   :  { %v1016_v47 = vsel %vm1707_vm5, %v1014_v42, %v987_v22  ;;  %v1021_v48 = vadd.f32 %v1019_v41, %v1017_v44 }
 0x88d   :  { %v1020_v49 = vadd.f32 %v1018_v43, %v1016_v47 }
 0x88e   :  { %1023 = vst.msk [vmem:[#allocation2 + $0x8] sm:$0xff] %vm50_vm0, %v1021_v48 }
 0x88f   :  { %1022 = vst.msk [vmem:[#allocation2] sm:$0xff] %vm50_vm0, %v1020_v49 }
 0x890   :  { %1316 = shalt.err (!%p1313_p4)
}
 0x891   :  { %s1317_s30 = scalar_lea.hbm %s1750_s9, 256 }
 0x892   :  { %p1318_p5 = scmp.ne.s32.totalorder %s1750_s9, %s1317_s30  ;;  %p1321_p6 = scmp.lt.u32.totalorder %s1317_s30, %s1750_s9 }
 0x894   :  { %p1323_p7 = pnand %p1321_p6, %p1318_p5 }
 0x896   :  { %1326 = shalt.err (!%p1323_p7)
}
 0x897   :  { %s1333_s14 = smov 128   ;;  %s1334_s15 = smov 8  }
 0x898   :  { %1035 = dma.vmem_to_hbm [thread:$0]  %s1030_s25, 256, %s1750_s9, [#allocation3], %s1333_s14, %s1333_s14, %s1334_s15  }
 0x899   :  { %1327 = dma.done.wait [#allocation3], 256  }
 0x89a   :  { %1328 = vsyncadd [#allocation3], 4294967040 }
 0x89b   :  { %1039 = vsyncpa [#allocation3], 1 }

</bundles_post_ra>
